<compile_context>
chip_gen: v5e
topology: v5e:2x2
jax: 0.10.0
libtpu: 0.0.40
codegen_flags: <defaults>
</compile_context>

<pallas_src>
import jax
import jax.numpy as jnp
from jax.experimental import pallas as pl
from jax.experimental.pallas import tpu as pltpu

BLOCKS_PER_STAGE = (1, 1, 1, 1)
_VMEM_LIMIT = 32 * 1024 * 1024   # scoped-VMEM limit, safe on v5e/v6e/v7x
LANE = 128


def _round_up(x, m):
    return (x + m - 1) // m * m


def _stored(c):
    """Stored (channel-padded) width: multiple of 128 lanes."""
    return _round_up(c, LANE)


def _choose_tile(dim, cap, unit):
    """Pick (tile, padded_dim): tile multiple of `unit`, <= cap if possible,
    padded_dim % tile == 0.  Prefers a tile dividing round_up(dim, unit)."""
    cap = max(unit, cap - cap % unit)
    dp = _round_up(dim, unit)
    if dp <= cap:
        return dp, dp
    best = unit
    for t in range(cap, unit - 1, -unit):
        if dp % t == 0:
            best = t
            break
    if best * 4 < cap:               # only tiny divisors exist: pad instead
        best = cap
        dp = _round_up(dim, cap)
    return best, dp


# ---------------------------------------------------------------------------
# Fused matmul + BN(scale,bias) + optional residual + optional ReLU kernel
# ---------------------------------------------------------------------------
def _make_mm_kernel(has_res: bool, do_relu: bool):
    def kernel(a_ref, w_ref, sb_ref, *rest):
        if has_res:
            r_ref, o_ref, acc_ref = rest
        else:
            o_ref, acc_ref = rest
        k = pl.program_id(2)

        @pl.when(k == 0)
        def _():
            acc_ref[...] = jnp.zeros_like(acc_ref)

        acc_ref[...] += jnp.dot(a_ref[...], w_ref[...],
                                preferred_element_type=jnp.float32)

        @pl.when(k == pl.num_programs(2) - 1)
        def _():
            scale = sb_ref[0:1, :]          # (1, tn) f32
            bias = sb_ref[1:2, :]           # (1, tn) f32
            y = acc_ref[...] * scale + bias
            if has_res:
                # TODO(synk): residual is bf16 here (PyTorch adds the f32
                # identity); deviation is tiny and halves the residual DMA.
                y = y + r_ref[...].astype(jnp.float32)
            if do_relu:
                y = jnp.maximum(y, 0.0)
            o_ref[...] = y.astype(o_ref.dtype)

    return kernel


def matmul_bn_act(a, w, scale, bias, residual=None, do_relu=True,
                  out_dtype=jnp.bfloat16):
    """out = maybe_relu((a @ w) * scale + bias (+ residual)).
    N (= w.shape[1]) must be a multiple of 128 and is kept padded on output."""
    M, K = a.shape
    K2, N = w.shape
    assert K == K2 and N % LANE == 0

    tm_cap = 512
    tm, Mp = _choose_tile(M, tm_cap, 16)      # 16: bf16 sublane packing

    # K tiling: use a single full-K block when it fits (handles K=147 stem
    # with no padding copy); only tile K for the big-M early layers.
    tk_cap = 8192 if Mp <= tm_cap else 1024
    if K <= tk_cap:
        tk, Kp = K, K
    else:
        tk, Kp = _choose_tile(K, tk_cap, LANE)

    # N tiling: lane-dense, and keep >=2 parallel grid blocks for v7x's 2 TCs.
    m_blocks = Mp // tm
    if m_blocks >= 2 or N < 2 * LANE:
        tn_cap = 512
    else:
        tn_cap = max(LANE, min(512, N // 2))
    tn, Np = _choose_tile(N, tn_cap, LANE)
    assert Np == N

    a = a.astype(jnp.bfloat16)
    w = w.astype(jnp.bfloat16)
    if Mp != M:
        a = jnp.pad(a, ((0, Mp - M), (0, 0)))
    if Kp != K:
        a = jnp.pad(a, ((0, 0), (0, Kp - K)))
        w = jnp.pad(w, ((0, Kp - K), (0, 0)))
    # scale & bias packed into one (2, N) f32 array -> one DMA per tile.
    sb = jnp.stack([scale.astype(jnp.float32), bias.astype(jnp.float32)])

    has_res = residual is not None
    inputs = [a, w, sb]
    in_specs = [
        pl.BlockSpec((tm, tk), lambda i, j, k: (i, k)),
        pl.BlockSpec((tk, tn), lambda i, j, k: (k, j)),
        pl.BlockSpec((2, tn), lambda i, j, k: (0, j)),
    ]
    if has_res:
        r = residual.astype(jnp.bfloat16)
        if Mp != M:
            r = jnp.pad(r, ((0, Mp - M), (0, 0)))
        inputs.append(r)
        # TODO(synk): residual could use pl.Buffered(1) / a last-K-step fetch
        # to free a little VMEM; left double-buffered for simplicity.
        in_specs.append(pl.BlockSpec((tm, tn), lambda i, j, k: (i, j)))

    out = pl.pallas_call(
        _make_mm_kernel(has_res, do_relu),
        out_shape=jax.ShapeDtypeStruct((Mp, N), out_dtype),
        grid_spec=pltpu.PrefetchScalarGridSpec(
            num_scalar_prefetch=0,
            grid=(Mp // tm, N // tn, Kp // tk),
            in_specs=in_specs,
            out_specs=pl.BlockSpec((tm, tn), lambda i, j, k: (i, j)),
            scratch_shapes=[pltpu.VMEM((tm, tn), jnp.float32)]),
        compiler_params=pltpu.CompilerParams(
            dimension_semantics=("parallel", "parallel", "arbitrary"),
            vmem_limit_bytes=_VMEM_LIMIT),
    )(*inputs)
    if Mp != M:
        out = out[:M]
    return out                                  # (M, N) - N stays padded


# ---------------------------------------------------------------------------
# Direct (no-im2col) 3x3 stride-1 pad-1 conv + BN + ReLU
# ---------------------------------------------------------------------------
def _make_conv3x3_kernel(cin_s, wq, m_out, do_relu):
    def kernel(a0_ref, a1_ref, a2_ref, w_ref, sb_ref, o_ref):
        a_refs = (a0_ref, a1_ref, a2_ref)
        acc = jnp.zeros((m_out, o_ref.shape[1]), jnp.float32)
        for kh in range(3):
            base = kh * wq                      # multiple of 8 -> aligned slice
            for kw in range(3):
                a_t = a_refs[kw][base:base + m_out, :]
                t = kh * 3 + kw
                w_t = w_ref[t * cin_s:(t + 1) * cin_s, :]
                acc = acc + jnp.dot(a_t, w_t,
                                    preferred_element_type=jnp.float32)
        y = acc * sb_ref[0:1, :] + sb_ref[1:2, :]
        if do_relu:
            y = jnp.maximum(y, 0.0)
        o_ref[...] = y.astype(o_ref.dtype)
    return kernel


def conv3x3_s1_direct(x, w_mat, scale, bias, do_relu=True):
    """3x3 / stride 1 / pad 1 conv + folded BN (+ReLU) without materializing an
    im2col array.  x: (B, H, W, Cin_s) bf16 NHWC with Cin_s % 128 == 0.
    w_mat: (9*Cin_s, Cout_s) bf16 in (kh, kw, cin) row order."""
    B, H, W, C = x.shape
    KC, N = w_mat.shape
    assert KC == 9 * C and C % LANE == 0 and N % LANE == 0

    wq = _round_up(W + 2, 8)                    # padded row pitch (aligned)
    # width = W + 1(left) + right = wq + 2 so every kw-shifted window fits.
    xb = jnp.pad(x.astype(jnp.bfloat16),
                 ((0, 0), (1, 1), (1, wq + 1 - W), (0, 0)))
    # One input-sized copy per kw shift (3 total) instead of a 9x im2col array.
    shifted = [xb[:, :, kw:kw + wq, :].reshape(B * (H + 2) * wq, C)
               for kw in range(3)]
    p_rows = (H + 2) * wq                       # per-image A rows (mult of 8)
    m_out = H * wq                              # per-image out rows (mult of 8)

    sb = jnp.stack([scale.astype(jnp.float32), bias.astype(jnp.float32)])
    tn, _ = _choose_tile(N, 512, LANE)

    out = pl.pallas_call(
        _make_conv3x3_kernel(C, wq, m_out, do_relu),
        out_shape=jax.ShapeDtypeStruct((B * m_out, N), jnp.bfloat16),
        grid_spec=pltpu.PrefetchScalarGridSpec(
            num_scalar_prefetch=0,
            grid=(B, N // tn),
            in_specs=[pl.BlockSpec((p_rows, C), lambda b, j: (b, 0)),
                      pl.BlockSpec((p_rows, C), lambda b, j: (b, 0)),
                      pl.BlockSpec((p_rows, C), lambda b, j: (b, 0)),
                      pl.BlockSpec((9 * C, tn), lambda b, j: (0, j)),
                      pl.BlockSpec((2, tn), lambda b, j: (0, j))],
            out_specs=pl.BlockSpec((m_out, tn), lambda b, j: (b, j))),
        compiler_params=pltpu.CompilerParams(
            dimension_semantics=("parallel", "parallel"),
            vmem_limit_bytes=_VMEM_LIMIT),
    )(*shifted, w_mat.astype(jnp.bfloat16), sb)
    # Drop the (wq - W) junk columns computed per output row.
    return out.reshape(B, H, wq, N)[:, :, :W, :]


# ---------------------------------------------------------------------------
# MaxPool2d(kernel=3, stride=2, padding=1): 3 width-shifted views in JAX,
# H-direction 3-way max done in-kernel (pure VPU, lane-dense).
# ---------------------------------------------------------------------------
def _maxpool_kernel(v0_ref, v1_ref, v2_ref, o_ref):
    ho = o_ref.shape[1]

    def hpool(vref):
        v = vref[0]                              # (Hp, Wo, C), Hp even
        hp = v.shape[0]
        vr = v.reshape(hp // 2, 2, v.shape[1], v.shape[2])
        even = vr[:, 0]
        pair = jnp.maximum(even, vr[:, 1])       # rows 2*oh, 2*oh+1
        return jnp.maximum(pair[0:ho], even[1:ho + 1])   # + row 2*oh+2

    m = jnp.maximum(jnp.maximum(hpool(v0_ref), hpool(v1_ref)), hpool(v2_ref))
    o_ref[0] = m


def maxpool_3x3_s2(x):
    """NHWC max-pool (3,2,1)."""
    B, H, W, C = x.shape
    Ho = (H + 2 - 3) // 2 + 1
    Wo = (W + 2 - 3) // 2 + 1
    assert (H + 2) % 2 == 0
    xp = jnp.pad(x, ((0, 0), (1, 1), (1, 1), (0, 0)),
                 constant_values=-jnp.inf)
    # 3 width-shifted stride-2 views (instead of 9 output-sized views).
    views = [xp[:, :, kw:kw + 2 * Wo:2, :] for kw in range(3)]   # (B,H+2,Wo,C)

    out = pl.pallas_call(
        _maxpool_kernel,
        out_shape=jax.ShapeDtypeStruct((B, Ho, Wo, C), x.dtype),
        grid=(B,),
        in_specs=[pl.BlockSpec((1, H + 2, Wo, C), lambda b: (b, 0, 0, 0))] * 3,
        out_specs=pl.BlockSpec((1, Ho, Wo, C), lambda b: (b, 0, 0, 0)),
        compiler_params=pltpu.CompilerParams(
            dimension_semantics=("parallel",),
            vmem_limit_bytes=_VMEM_LIMIT),
    )(*views)
    return out


# ---------------------------------------------------------------------------
# Convolution dispatcher
# ---------------------------------------------------------------------------
def conv_bn(x, w_mat, scale, bias, kh, kw, stride, padding,
            residual=None, do_relu=True):
    """x: (B,H,W,Cin_s) bf16 NHWC; w_mat: (kh*kw*Cin_s, Cout_s) bf16."""
    B, H, W, C = x.shape
    Ho = (H + 2 * padding - kh) // stride + 1
    Wo = (W + 2 * padding - kw) // stride + 1
    Cout = w_mat.shape[1]

    if kh == 1 and kw == 1 and padding == 0:
        a = x[:, ::stride, ::stride, :].reshape(B * Ho * Wo, C)
    elif (kh == 3 and kw == 3 and stride == 1 and padding == 1
          and residual is None and C % LANE == 0):
        return conv3x3_s1_direct(x, w_mat, scale, bias, do_relu=do_relu)
    else:
        # TODO(synk): the 7x7 stem and stride-2 3x3 convs still build an
        # im2col matrix (jit-fused); a space-to-depth rewrite would remove it.
        xp = jnp.pad(x, ((0, 0), (padding, padding), (padding, padding), (0, 0)))
        cols = [xp[:, i:i + stride * Ho:stride, j:j + stride * Wo:stride, :]
                for i in range(kh) for j in range(kw)]
        a = jnp.concatenate(cols, axis=-1).reshape(B * Ho * Wo, kh * kw * C)

    r = None if residual is None else residual.reshape(B * Ho * Wo, Cout)
    y = matmul_bn_act(a, w_mat, scale, bias, residual=r, do_relu=do_relu)
    return y.reshape(B, Ho, Wo, Cout)


# ---------------------------------------------------------------------------
# Parameter init (deterministic, synthetic); BN folded into scale/bias.
# Weights stored bf16 in matmul layout, channel-padded to multiples of 128.
# ---------------------------------------------------------------------------
def _fold_bn(key, cout, cout_s):
    k1, k2, k3, k4 = jax.random.split(key, 4)
    gamma = 1.0 + 0.1 * jax.random.normal(k1, (cout,), jnp.float32)
    beta = 0.1 * jax.random.normal(k2, (cout,), jnp.float32)
    mean = 0.1 * jax.random.normal(k3, (cout,), jnp.float32)
    var = jnp.abs(1.0 + 0.1 * jax.random.normal(k4, (cout,), jnp.float32))
    inv = gamma / jnp.sqrt(var + 1e-5)
    scale = jnp.pad(inv, (0, cout_s - cout))             # padded channels -> 0
    bias = jnp.pad(beta - mean * inv, (0, cout_s - cout))
    return scale, bias


def _conv_w_mat(key, kh, kw, cin, cout, cin_s, cout_s):
    fan_in = kh * kw * cin
    w = jax.random.normal(key, (kh, kw, cin, cout), jnp.float32)
    w = w * jnp.sqrt(2.0 / fan_in)
    w = jnp.pad(w, ((0, 0), (0, 0), (0, cin_s - cin), (0, cout_s - cout)))
    return w.reshape(kh * kw * cin_s, cout_s).astype(jnp.bfloat16)


def init_bottleneck(key, cin, width, downsample):
    keys = jax.random.split(key, 8)
    cin_s, w_s, out_s = _stored(cin), _stored(width), _stored(4 * width)
    p = {}
    p['w1'] = _conv_w_mat(keys[0], 1, 1, cin, width, cin_s, w_s)
    p['s1'], p['b1'] = _fold_bn(keys[1], width, w_s)
    p['w2'] = _conv_w_mat(keys[2], 3, 3, width, width, w_s, w_s)
    p['s2'], p['b2'] = _fold_bn(keys[3], width, w_s)
    p['w3'] = _conv_w_mat(keys[4], 1, 1, width, 4 * width, w_s, out_s)
    p['s3'], p['b3'] = _fold_bn(keys[5], 4 * width, out_s)
    if downsample:
        p['wd'] = _conv_w_mat(keys[6], 1, 1, cin, 4 * width, cin_s, out_s)
        p['sd'], p['bd'] = _fold_bn(keys[7], 4 * width, out_s)
    return p


def init_params(key, blocks=BLOCKS_PER_STAGE):
    params = {}
    key, k0, k1 = jax.random.split(key, 3)
    params['conv1_w'] = _conv_w_mat(k0, 7, 7, 3, 64, 3, _stored(64))
    params['conv1_s'], params['conv1_b'] = _fold_bn(k1, 64, _stored(64))
    cin = 64
    widths = (64, 128, 256, 512)
    stages = []
    for si in range(4):
        blocks_p = []
        for bi in range(blocks[si]):
            key, bk = jax.random.split(key)
            blocks_p.append(init_bottleneck(bk, cin, widths[si], bi == 0))
            cin = 4 * widths[si]
        stages.append(blocks_p)
    params['stages'] = stages
    return params


# ---------------------------------------------------------------------------
# Forward pass (matches ResNet.forward in modules/visual_extractor.py)
# ---------------------------------------------------------------------------
def bottleneck(x, p, stride):
    if 'wd' in p:
        identity = conv_bn(x, p['wd'], p['sd'], p['bd'], 1, 1, stride, 0,
                           do_relu=False)
    else:
        identity = x
    out = conv_bn(x, p['w1'], p['s1'], p['b1'], 1, 1, 1, 0, do_relu=True)
    out = conv_bn(out, p['w2'], p['s2'], p['b2'], 3, 3, stride, 1, do_relu=True)
    out = conv_bn(out, p['w3'], p['s3'], p['b3'], 1, 1, 1, 0,
                  residual=identity, do_relu=True)
    return out


def resnet_visual_extractor(images_nchw, params):
    # (B, 3, H, W) NCHW -> NHWC bf16 internally.
    x = jnp.transpose(images_nchw, (0, 2, 3, 1)).astype(jnp.bfloat16)
    x = conv_bn(x, params['conv1_w'], params['conv1_s'], params['conv1_b'],
                7, 7, 2, 3, do_relu=True)        # (B,112,112,128 stored)
    x = maxpool_3x3_s2(x)                        # (B, 56, 56,128 stored)
    for si, stage in enumerate(params['stages']):
        for bi, blk in enumerate(stage):
            stride = 2 if (si > 0 and bi == 0) else 1
            x = bottleneck(x, blk, stride)
    B, H, W, C = x.shape                         # (B, 7, 7, 2048); 2048 needs
    # no channel unpadding (stored == logical at the final stage).
    # torch: patch_feats.reshape(B, C, H*W).permute(0, 2, 1) == NHWC reshape.
    patch_feats = x.astype(jnp.float32).reshape(B, H * W, C)
    # torch: AvgPool2d(7)(...).squeeze().reshape(-1, C) == mean over 49 tokens
    # (plain JAX; too small to justify a dedicated kernel).
    avg_feats = jnp.mean(patch_feats, axis=1)
    return patch_feats, avg_feats


resnet_forward = jax.jit(resnet_visual_extractor)


if __name__ == "__main__":
    # --- unit test: fused matmul kernel vs jnp reference --------------------
    ka, kw_, ks, kb, kr = jax.random.split(jax.random.PRNGKey(42), 5)
    a = jax.random.normal(ka, (200, 96), jnp.float32)
    w = jax.random.normal(kw_, (96, 256), jnp.float32) * 0.1
    s = 1.0 + 0.1 * jax.random.normal(ks, (256,), jnp.float32)
    b = 0.1 * jax.random.normal(kb, (256,), jnp.float32)
    r = jax.random.normal(kr, (200, 256), jnp.float32)
    got = matmul_bn_act(a, w, s, b, residual=r, do_relu=True).astype(jnp.float32)
    a16 = a.astype(jnp.bfloat16).astype(jnp.float32)
    w16 = w.astype(jnp.bfloat16).astype(jnp.float32)
    r16 = r.astype(jnp.bfloat16).astype(jnp.float32)
    ref = jnp.maximum((a16 @ w16) * s + b + r16, 0.0)
    jax.block_until_ready(got)
    assert bool(jnp.allclose(got, ref, rtol=3e-2, atol=3e-2)), "matmul mismatch"

    # --- unit test: direct 3x3 conv kernel vs im2col reference --------------
    kx, kw2, ks2, kb2 = jax.random.split(jax.random.PRNGKey(7), 4)
    Ct = 128
    xt = jax.random.normal(kx, (2, 8, 8, Ct), jnp.float32)
    wt = jax.random.normal(kw2, (3, 3, Ct, Ct), jnp.float32) * (2.0 / (9 * Ct)) ** 0.5
    st = 1.0 + 0.1 * jax.random.normal(ks2, (Ct,), jnp.float32)
    bt = 0.1 * jax.random.normal(kb2, (Ct,), jnp.float32)
    wmat = wt.reshape(9 * Ct, Ct)
    got = conv3x3_s1_direct(xt.astype(jnp.bfloat16), wmat.astype(jnp.bfloat16),
                            st, bt, do_relu=True).astype(jnp.float32)
    x16 = xt.astype(jnp.bfloat16).astype(jnp.float32)
    w16 = wt.astype(jnp.bfloat16).astype(jnp.float32).reshape(9 * Ct, Ct)
    xpad = jnp.pad(x16, ((0, 0), (1, 1), (1, 1), (0, 0)))
    cols = [xpad[:, i:i + 8, j:j + 8, :] for i in range(3) for j in range(3)]
    aref = jnp.concatenate(cols, axis=-1).reshape(2 * 64, 9 * Ct)
    ref = jnp.maximum((aref @ w16) * st + bt, 0.0).reshape(2, 8, 8, Ct)
    jax.block_until_ready(got)
    assert bool(jnp.allclose(got, ref, rtol=5e-2, atol=5e-2)), "conv3x3 mismatch"

    # --- unit test: maxpool kernel vs reduce_window reference ---------------
    kp = jax.random.PRNGKey(3)
    xt = jax.random.normal(kp, (2, 16, 16, 128), jnp.float32).astype(jnp.bfloat16)
    got = maxpool_3x3_s2(xt).astype(jnp.float32)
    ref = jax.lax.reduce_window(xt.astype(jnp.float32), -jnp.inf, jax.lax.max,
                                (1, 3, 3, 1), (1, 2, 2, 1),
                                ((0, 0), (1, 1), (1, 1), (0, 0)))
    jax.block_until_ready(got)
    assert bool(jnp.allclose(got, ref)), "maxpool mismatch"

    # --- full forward pass (jitted) ------------------------------------------
    key = jax.random.PRNGKey(0)
    pkey, xkey = jax.random.split(key)
    params = init_params(pkey)

    B = 2
    images = jax.random.normal(xkey, (B, 3, 224, 224), jnp.float32)

    patch_feats, avg_feats = resnet_forward(images, params)
    jax.block_until_ready((patch_feats, avg_feats))

    assert patch_feats.shape == (B, 49, 2048), patch_feats.shape
    assert avg_feats.shape == (B, 2048), avg_feats.shape
    assert bool(jnp.all(jnp.isfinite(patch_feats)))
    assert bool(jnp.all(jnp.isfinite(avg_feats)))

    print("KERNEL_OK")
</pallas_src>

<mosaic_0001>
module attributes {stable_mosaic.version = 11 : i64} {
  func.func @kernel(%arg0: i32, %arg1: i32, %arg2: i32, %arg3: memref<208x96xbf16, #tpu.memory_space<vmem>>, %arg4: memref<96x128xbf16, #tpu.memory_space<vmem>>, %arg5: memref<2x128xf32, #tpu.memory_space<vmem>>, %arg6: memref<208x128xbf16, #tpu.memory_space<vmem>>, %arg7: memref<208x128xbf16, #tpu.memory_space<vmem>>, %arg8: memref<208x128xf32, #tpu.memory_space<vmem>>) attributes {dimension_semantics = [#tpu.dimension_semantics<parallel>, #tpu.dimension_semantics<parallel>, #tpu.dimension_semantics<arbitrary>], iteration_bounds = array<i64: 1, 2, 1>, scalar_prefetch = 0 : i64, scratch_operands = 1 : i64, tpu.core_type = #tpu.core_type<tc>, window_params = [{transform_indices = @transform_0, window_bounds = array<i64: 208, 96>}, {transform_indices = @transform_1, window_bounds = array<i64: 96, 128>}, {transform_indices = @transform_2, window_bounds = array<i64: 2, 128>}, {transform_indices = @transform_3, window_bounds = array<i64: 208, 128>}, {transform_indices = @transform_4, window_bounds = array<i64: 208, 128>}]} {
    %c0_i32 = arith.constant 0 : i32
    %0 = arith.cmpi eq, %arg2, %c0_i32 : i32
    %1 = arith.extui %0 : i1 to i32
    %c0_i32_0 = arith.constant 0 : i32
    %2 = arith.cmpi ne, %1, %c0_i32_0 : i32
    scf.if %2 {
      %cst_10 = arith.constant 0.000000e+00 : f32
      %12 = vector.broadcast %cst_10 : f32 to vector<208x128xf32>
      %c0_11 = arith.constant 0 : index
      %c0_12 = arith.constant 0 : index
      %13 = vector.load %arg8[%c0_11, %c0_12] : memref<208x128xf32, #tpu.memory_space<vmem>>, vector<208x128xf32>
      tpu.vector_store %arg8[%c0_11, %c0_12], %12 {strides = array<i32>} : memref<208x128xf32, #tpu.memory_space<vmem>>, vector<208x128xf32>,
    } else {
    }
    %c0 = arith.constant 0 : index
    %c0_1 = arith.constant 0 : index
    %3 = vector.load %arg8[%c0, %c0_1] : memref<208x128xf32, #tpu.memory_space<vmem>>, vector<208x128xf32>
    %c0_2 = arith.constant 0 : index
    %c0_3 = arith.constant 0 : index
    %4 = vector.load %arg3[%c0_2, %c0_3] : memref<208x96xbf16, #tpu.memory_space<vmem>>, vector<208x96xbf16>
    %c0_4 = arith.constant 0 : index
    %c0_5 = arith.constant 0 : index
    %5 = vector.load %arg4[%c0_4, %c0_5] : memref<96x128xbf16, #tpu.memory_space<vmem>>, vector<96x128xbf16>
    %cst = arith.constant dense<0.000000e+00> : vector<208x128xf32>
    %6 = tpu.matmul %4, %5, %cst {dimension_numbers = #tpu.dot_dimension_numbers<[1], [0], [0], [1], [0, 0, 1, 1], [], []>} : vector<208x96xbf16>, vector<96x128xbf16>, vector<208x128xf32> -> vector<208x128xf32>
    %7 = arith.addf %3, %6 : vector<208x128xf32>
    %c0_6 = arith.constant 0 : index
    %c0_7 = arith.constant 0 : index
    %8 = vector.load %arg8[%c0_6, %c0_7] : memref<208x128xf32, #tpu.memory_space<vmem>>, vector<208x128xf32>
    tpu.vector_store %arg8[%c0_6, %c0_7], %7 {strides = array<i32>} : memref<208x128xf32, #tpu.memory_space<vmem>>, vector<208x128xf32>,
    %c0_i32_8 = arith.constant 0 : i32
    %9 = arith.cmpi eq, %arg2, %c0_i32_8 : i32
    %10 = arith.extui %9 : i1 to i32
    %c0_i32_9 = arith.constant 0 : i32
    %11 = arith.cmpi ne, %10, %c0_i32_9 : i32
    scf.if %11 {
      %c0_10 = arith.constant 0 : index
      %c0_11 = arith.constant 0 : index
      %12 = vector.load %arg5[%c0_10, %c0_11] : memref<2x128xf32, #tpu.memory_space<vmem>>, vector<1x128xf32>
      %c1 = arith.constant 1 : index
      %c0_12 = arith.constant 0 : index
      %13 = vector.load %arg5[%c1, %c0_12] : memref<2x128xf32, #tpu.memory_space<vmem>>, vector<1x128xf32>
      %c0_13 = arith.constant 0 : index
      %c0_14 = arith.constant 0 : index
      %14 = vector.load %arg8[%c0_13, %c0_14] : memref<208x128xf32, #tpu.memory_space<vmem>>, vector<208x128xf32>
      %15 = vector.broadcast %12 : vector<1x128xf32> to vector<208x128xf32>
      %16 = arith.mulf %14, %15 : vector<208x128xf32>
      %17 = vector.broadcast %13 : vector<1x128xf32> to vector<208x128xf32>
      %18 = arith.addf %16, %17 : vector<208x128xf32>
      %c0_15 = arith.constant 0 : index
      %c0_16 = arith.constant 0 : index
      %19 = vector.load %arg6[%c0_15, %c0_16] : memref<208x128xbf16, #tpu.memory_space<vmem>>, vector<208x128xbf16>
      %20 = arith.extf %19 : vector<208x128xbf16> to vector<208x128xf32>
      %21 = arith.addf %18, %20 : vector<208x128xf32>
      %cst_17 = arith.constant 0.000000e+00 : f32
      %22 = vector.broadcast %cst_17 : f32 to vector<208x128xf32>
      %23 = arith.maximumf %21, %22 : vector<208x128xf32>
      %24 = arith.truncf %23 : vector<208x128xf32> to vector<208x128xbf16>
      %c0_18 = arith.constant 0 : index
      %c0_19 = arith.constant 0 : index
      %25 = vector.load %arg7[%c0_18, %c0_19] : memref<208x128xbf16, #tpu.memory_space<vmem>>, vector<208x128xbf16>
      tpu.vector_store %arg7[%c0_18, %c0_19], %24 {strides = array<i32>} : memref<208x128xbf16, #tpu.memory_space<vmem>>, vector<208x128xbf16>,
    } else {
    }
    return
  }
  func.func @transform_0(%arg0: i32, %arg1: i32, %arg2: i32) -> (i32, i32) {
    %c0_i32 = arith.constant 0 : i32
    return %arg0, %arg2 : i32, i32
  }
  func.func @transform_1(%arg0: i32, %arg1: i32, %arg2: i32) -> (i32, i32) {
    %c0_i32 = arith.constant 0 : i32
    return %arg2, %arg1 : i32, i32
  }
  func.func @transform_2(%arg0: i32, %arg1: i32, %arg2: i32) -> (i32, i32) {
    %c0_i32 = arith.constant 0 : i32
    %c0_i32_0 = arith.constant 0 : i32
    return %c0_i32, %arg1 : i32, i32
  }
  func.func @transform_3(%arg0: i32, %arg1: i32, %arg2: i32) -> (i32, i32) {
    %c0_i32 = arith.constant 0 : i32
    return %arg0, %arg1 : i32, i32
  }
  func.func @transform_4(%arg0: i32, %arg1: i32, %arg2: i32) -> (i32, i32) {
    %c0_i32 = arith.constant 0 : i32
    return %arg0, %arg1 : i32, i32
  }
}

</mosaic_0001>

<bundles_post_ra>
// kernel: tpu_custom_call.1
= control target key start
LH: loop header
LB: loop body
LE: loop exit
PB: predicated region body
PF: predicated region fallthrough
CT: control target
= control target key end

     0   :  { %9 = vsyncpa [#allocation5], 0  ;;  %s1947_s0 = inlined_call_operand.vmem [shape: bf16[208,96], index: 0, kind: input, shape index: {}]   ;;  %s1948_s1 = inlined_call_operand.vmem [shape: bf16[96,256], index: 1, kind: input, shape index: {}]   ;;  %s1949_s2 = inlined_call_operand.vmem [shape: f32[2,256], index: 2, kind: input, shape index: {}]   ;;  %s1950_s3 = inlined_call_operand.hbm [shape: bf16[208,256], index: 3, kind: input, shape index: {}]   ;;  %s1951_s4 = inlined_call_operand.hbm [shape: bf16[208,256], index: 4, kind: output, shape index: {}]  }
   0x1   :  { %11 = vsyncpa [#allocation5 + $0x1], 0 }
   0x2   :  { %12 = vsyncpa [#allocation6], 0 }
   0x3   :  { %14 = vsyncpa [#allocation6 + $0x1], 0  ;;  %s1658_s15 = smov 0   ;;  %s1660_s16 = smov 0  }
   0x4   :  { %s1662_s17 = smov 0   ;;  %s1664_s18 = smov 0  }
   0x5   :  { %s1666_s19 = smov 0   ;;  %s1668_s20 = smov 0  }
   0x6 LB: > { %s1167_s21 = sadd.s32 4294967295, %s1625_s20   ;;  %s1168_s22 = sadd.s32 4294967294, %s1625_s20   ;;  %s1625_s20 = sphi %s1668_s20, %s20_s20   ;;  %s1621_s19 = sphi %s1666_s19, %s1960_s19   ;;  %s1617_s18 = sphi %s1664_s18, %s1959_s18   ;;  %s1613_s17 = sphi %s1662_s17, %s1958_s17   ;;  %s1609_s16 = sphi %s1660_s16, %s1957_s16   ;;  %s1605_s15 = sphi %s1658_s15, %s1956_s15  }
   0x7   : > { %s35_s23 = sadd.s32 1, %s1621_s19  ;;  %s76_s24 = sadd.s32 1, %s1613_s17 }
   0x8   : > { %p37_p0 = scmp.ge.s32.totalorder %s35_s23, 2  ;;  %p83_p1 = scmp.ne.s32.totalorder %s1613_s17, %s1609_s16 }
   0x9   : > { %p84_p2 = scmp.eq.s32.totalorder %s1625_s20, 0  ;;  %p143_p3 = scmp.ne.s32.totalorder %s1609_s16, %s1605_s15 }
   0xa   : > { %s1962_s23 = smov (%p37_p0, %s35_s23), 0  ;;  %p144_p5 = scmp.eq.s32.totalorder %s1167_s21, 0 }
   0xb   : > { %p1699_p4 = por %p84_p2, %p83_p1  ;;  %s72_s26 = ssub.s32 %s1621_s19, %s1962_s23 }
   0xc   : > { %p169_p6 = scmp.eq.s32.totalorder %s1167_s21, 1  ;;  %p74_p7 = scmp.eq.s32.totalorder %s72_s26, 0 }
   0xd   : > { %p1705_p8 = por %p144_p5, %p143_p3  ;;  %p175_p10 = scmp.eq.s32.totalorder %s1168_s22, 1 }
   0xe   : > { %p1709_p9 = por %p169_p6, %p83_p1  ;;  %p1171_p12 = scmp.ge.s32.totalorder %s1625_s20, 2 }
   0xf   : > { %s1714_s29 = scalar_select %p74_p7, %s1613_s17, %s76_s24  }
  0x10   : > { %p1716_p11 = por %p175_p10, %p143_p3  ;;  %203 = sbr.rel (%p1171_p12) target bundleno = 45 (0x2d), region = 20 }
  0x15   : > { %206 = sbr.rel (!%p1699_p4) target bundleno = 38 (0x26), region = 24  ;;  %s208_s5 = sand.u32 (%p1699_p4), 1, %s1613_s17  }
  0x16   : > { %s1172_s6 = sshll.u32 (%p1699_p4), %s1621_s19, 2  ;;  %s1446_s7 = smul.u32 (%p1699_p4), 48, %s208_s5 }
  0x17   : > { %s215_s10 = scalar_lea.vmem (%p1699_p4), %s1948_s1, %s1172_s6 }
  0x18   : > { %v232_v0 = vld [vmem:[%s215_s10] sm:$0xf] (%p1699_p4)  ;;  %v234_v1 = vld [vmem:[%s215_s10 + $0x8] sm:$0xf] (%p1699_p4)  ;;  %v236_v2 = vld [vmem:[%s215_s10 + $0x10] sm:$0xf] (%p1699_p4) }
  0x19   : > { %s210_s11 = scalar_lea.vmem (%p1699_p4), [#allocation3], %s1446_s7  ;;  %v238_v3 = vld [vmem:[%s215_s10 + $0x18] sm:$0xf] (%p1699_p4)  ;;  %v240_v4 = vld [vmem:[%s215_s10 + $0x20] sm:$0xf] (%p1699_p4) }
  0x1a   : > { %233 = vst [vmem:[%s210_s11] sm:$0xf] %v232_v0  ;;  %v242_v5 = vld [vmem:[%s215_s10 + $0x28] sm:$0xf]  ;;  %v244_v6 = vld [vmem:[%s215_s10 + $0x30] sm:$0xf] }
  0x1b   : > { %235 = vst [vmem:[%s210_s11 + $0x4] sm:$0xf] %v234_v1  ;;  %v246_v7 = vld [vmem:[%s215_s10 + $0x38] sm:$0xf]  ;;  %v248_v8 = vld [vmem:[%s215_s10 + $0x40] sm:$0xf] }
  0x1c   : > { %237 = vst [vmem:[%s210_s11 + $0x8] sm:$0xf] %v236_v2  ;;  %v250_v9 = vld [vmem:[%s215_s10 + $0x48] sm:$0xf]  ;;  %v252_v10 = vld [vmem:[%s215_s10 + $0x50] sm:$0xf] }
  0x1d   : > { %239 = vst [vmem:[%s210_s11 + $0xc] sm:$0xf] %v238_v3  ;;  %v254_v11 = vld [vmem:[%s215_s10 + $0x58] sm:$0xf] }
  0x1e   : > { %241 = vst [vmem:[%s210_s11 + $0x10] sm:$0xf] %v240_v4 }
  0x1f   : > { %243 = vst [vmem:[%s210_s11 + $0x14] sm:$0xf] %v242_v5 }
  0x20   : > { %245 = vst [vmem:[%s210_s11 + $0x18] sm:$0xf] %v244_v6 }
  0x21   : > { %247 = vst [vmem:[%s210_s11 + $0x1c] sm:$0xf] %v246_v7 }
  0x22   : > { %249 = vst [vmem:[%s210_s11 + $0x20] sm:$0xf] %v248_v8 }
  0x23   : > { %251 = vst [vmem:[%s210_s11 + $0x24] sm:$0xf] %v250_v9 }
  0x24   : > { %253 = vst [vmem:[%s210_s11 + $0x28] sm:$0xf] %v252_v10 }
  0x25   : > { %255 = vst [vmem:[%s210_s11 + $0x2c] sm:$0xf] %v254_v11 }
  0x26 PF: > { %s311_s12 = sand.u32 1, %s1613_s17   ;;  %s1173_s13 = sshll.u32 %s1621_s19, 2 }
  0x27   : > { %s1447_s14 = smul.u32 104, %s311_s12  ;;  %s322_s24 = scalar_lea.hbm %s1950_s3, %s1173_s13 }
  0x28   : > { %s323_s26 = sshll.u32 %s322_s24, 4  ;;  %s312_s7 = scalar_lea.sflag [#allocation5], %s311_s12  ;;  %s324_s26 = int_to_ptr.hbm [resolvable:$true] %s323_s26 }
  0x29   : > { %s315_s5 = scalar_lea.vmem [#allocation4], %s1447_s14  ;;  %s1627_s8 = smov 128  }
  0x2a   : > { %s325_s6 = sshll.u32 %s315_s5, 4  ;;  %s1628_s9 = smov 64   ;;  %s326_s6 = int_to_ptr.vmem [resolvable:$true] %s325_s6 }
  0x2b   : > { %s1629_s10 = smov 4  }
  0x2c   : > { %1450 = dma.hbm_to_vmem [thread:$0]  (%p1699_p4), %s324_s26, 1664, %s326_s6, %s312_s7, %s1627_s8, %s1628_s9, %s1629_s10  }
  0x2d PF: > { %p1174_p13 = scmp.ge.s32.totalorder %s1625_s20, 1  ;;  %p333_p0 = scmp.lt.s32.totalorder %s1625_s20, 3 }
  0x2f   : > { %p334_p1 = pnand %p1174_p13, %p333_p0 }
  0x30   : > { %s1740_s11 = sand.u32 (!%p334_p1), 1, %s1609_s16  }
  0x31   : > { %337 = sbr.rel (%p334_p1) target bundleno = 282 (0x11a), region = 73  ;;  %s347_s25 = scalar_lea.sflag (!%p334_p1), [#allocation5], %s1740_s11 }
  0x32   : > { %s1448_s12 = smul.u32 (!%p334_p1), 48, %s1740_s11 }
  0x33   : > { %s1449_s13 = smul.u32 (!%p334_p1), 104, %s1740_s11 }
  0x34   : > { %s1744_s14 = scalar_lea.vmem (!%p334_p1), [#allocation3], %s1448_s12 }
  0x35   : > { %s1749_s21 = scalar_lea.vmem (!%p334_p1), [#allocation4], %s1449_s13 }
  0x36   : > { %1596 = dma.done.wait (%p1705_p8), %s347_s25, 1664  }
  0x37   : > { %1598 = vsyncadd (%p1705_p8), %s347_s25, 4294965632  ;;  %p402_p2 = scmp.lt.s32.totalorder %s1617_s18, 1  ;;  %v1286_v12 = vld [vmem:[%s1744_s14 + $0x28] sm:$0xff]  ;;  %v1285_v13 = vld [vmem:[%s1744_s14 + $0x20] sm:$0xff]  ;;  %vm604_vm0 = vcmask 785408   ;;  %s1563_s26 = scalar_lea.hbm %s1951_s4, 208 }
  0x38   : > { %1429 = vmatpush.bf16.msra.mxu2 %v1286_v12  ;;  %1430 = vmatpush.bf16.msra.mxu3 %v1286_v12  ;;  %v1284_v14 = vld [vmem:[%s1744_s14 + $0x18] sm:$0xff]  ;;  %v1283_v15 = vld [vmem:[%s1744_s14 + $0x10] sm:$0xff]  ;;  %v1282_v16 = vld [vmem:[%s1744_s14 + $0x8] sm:$0xff] }
  0x39   : > { %s403_s22 = scalar_select %p402_p2, %s1617_s18, 1  ;;  %646 = vmatpush.bf16.msra.mxu0 %v1286_v12  ;;  %1428 = vmatpush.bf16.msra.mxu1 %v1286_v12  ;;  %v1281_v17 = vld [vmem:[%s1744_s14] sm:$0xff]  ;;  %v1271_v21 = vld [vmem:[%s1947_s0 + $0x18] sm:$0xff]  ;;  %v1269_v24 = vld [vmem:[%s1947_s0 + $0x8] sm:$0xff] }
  0x3a   : > { %v1274_v18 = vld [vmem:[%s1947_s0 + $0x30] sm:$0xff]  ;;  %v1268_v20 = vld [vmem:[%s1947_s0] sm:$0xff]  ;;  %v1275_v22 = vld [vmem:[%s1947_s0 + $0x38] sm:$0xff] }
  0x3b   : > { %s1175_s24 = sshll.u32 %s403_s22, 1  ;;  %v1278_v19 = vld [vmem:[%s1947_s0 + $0x50] sm:$0xff]  ;;  %v1279_v23 = vld [vmem:[%s1947_s0 + $0x58] sm:$0xff]  ;;  %v1272_v25 = vld [vmem:[%s1947_s0 + $0x20] sm:$0xff] }
  0x3c   : > { %s1762_s6 = scalar_lea.vmem %s1949_s2, %s1175_s24  ;;  %1432 = vmatpush.bf16.msra.mxu2 %v1285_v13  ;;  %1433 = vmatpush.bf16.msra.mxu3 %v1285_v13  ;;  %v1276_v26 = vld [vmem:[%s1947_s0 + $0x40] sm:$0xff]  ;;  %v1270_v28 = vld [vmem:[%s1947_s0 + $0x10] sm:$0xff]  ;;  %v1273_v29 = vld [vmem:[%s1947_s0 + $0x28] sm:$0xff] }
  0x3d   : > { %647 = vmatpush.bf16.msra.mxu0 %v1285_v13  ;;  %1431 = vmatpush.bf16.msra.mxu1 %v1285_v13  ;;  %v1280_v27 = vld [vmem:[%s1947_s0 + $0x60] sm:$0xff]  ;;  %v1277_v30 = vld [vmem:[%s1947_s0 + $0x48] sm:$0xff]  ;;  %v1413_v46 = vld [vmem:[%s1749_s21 + $0x50] sm:$0xff]  }
  0x3e   : > { %v1821_v31 = vld [vmem:[%s1762_s6] ss:$0 sm:$0xff]  ;;  %v1828_v38 = vld [vmem:[%s1762_s6 + $0x1] ss:$0 sm:$0xff]  ;;  %v1409_v52 = vld [vmem:[%s1749_s21 + $0x30] sm:$0xff]   ;;  %v1329_v58 = vunpack.c.l.bf16 %v1413_v46  ;;  %v1330_v9 = vunpack.c.h.bf16 %v1413_v46  ;;  %s1852_s6 = scalar_lea.vmem [#allocation7], %s1449_s13 }
  0x3f   : > { %v1288_v36 = vld [vmem:[%s1749_s21] sm:$0xff]   ;;  %v1406_v37 = vld [vmem:[%s1749_s21 + $0x18] sm:$0xff]   ;;  %v1313_v62 = vunpack.c.l.bf16 %v1409_v52  ;;  %v1314_v63 = vunpack.c.h.bf16 %v1409_v52  ;;  %s1265_s13 = sshll.u32 %s1617_s18, 2  ;;  %s1012_s18 = scalar_lea.sflag [#allocation6], %s1740_s11 }
  0x40   : > { %1435 = vmatpush.bf16.msra.mxu2 %v1284_v14  ;;  %1436 = vmatpush.bf16.msra.mxu3 %v1284_v14  ;;  %v1289_v41 = vunpack.c.l.bf16 %v1288_v36  ;;  %v1301_v43 = vunpack.c.l.bf16 %v1406_v37  ;;  %v1290_v49 = vunpack.c.h.bf16 %v1288_v36  ;;  %v1302_v51 = vunpack.c.h.bf16 %v1406_v37  ;;  %v1410_v46 = vld [vmem:[%s1749_s21 + $0x38] sm:$0xff]   ;;  %s1025_s10 = scalar_lea.hbm %s1951_s4, %s1265_s13 }
  0x41   : > { %648 = vmatpush.bf16.msra.mxu0 %v1284_v14  ;;  %1434 = vmatpush.bf16.msra.mxu1 %v1284_v14  ;;  %s1028_s12 = sshll.u32 %s1025_s10, 4  ;;  %s1029_s12 = int_to_ptr.hbm [resolvable:$true] %s1028_s12 }
  0x42   : > { %s1557_s25 = sshra.s32 %s1029_s12, 4  ;;  %s1558_s25 = int_to_ptr.hbm [resolvable:$true] %s1557_s25 }
  0x43   : > { %s1559_s14 = scalar_lea.hbm %s1558_s25, 104  ;;  %p1564_p6 = scmp.lt.s32.totalorder %s1558_s25, %s1951_s4 }
  0x44   : > { %1438 = vmatpush.bf16.msra.mxu2 %v1283_v15  ;;  %1439 = vmatpush.bf16.msra.mxu3 %v1283_v15  ;;  %p1560_p3 = scmp.ne.s32.totalorder %s1558_s25, %s1559_s14  ;;  %p1565_p7 = scmp.lt.s32.totalorder %s1563_s26, %s1559_s14 }
  0x45   : > { %649 = vmatpush.bf16.msra.mxu0 %v1283_v15  ;;  %1437 = vmatpush.bf16.msra.mxu1 %v1283_v15 }
  0x46   : > { %p1561_p4 = pnand %p1560_p3, %p1709_p9  ;;  %p1566_p8 = por %p1565_p7, %p1564_p6 }
  0x48   : > { %1441 = vmatpush.bf16.msra.mxu2 %v1282_v16  ;;  %1442 = vmatpush.bf16.msra.mxu3 %v1282_v16  ;;  %p1562_p5 = pneg %p1561_p4 }
  0x49   : > { %650 = vmatpush.bf16.msra.mxu0 %v1282_v16  ;;  %1440 = vmatpush.bf16.msra.mxu1 %v1282_v16 }
  0x4a   : > { %p1567_p10 = pnand %p1566_p8, %p1562_p5 }
  0x4c   : > { %1444 = vmatpush.bf16.msra.mxu2 %v1281_v17  ;;  %1445 = vmatpush.bf16.msra.mxu3 %v1281_v17 }
  0x4d   : > { %651 = vmatpush.bf16.msra.mxu0 %v1281_v17  ;;  %1443 = vmatpush.bf16.msra.mxu1 %v1281_v17 }
  0x4f   : > { %1258 = vmatmul.msk.bf16.vlgmr.msra.gmra.mxu2 %vm604_vm0, %v1274_v18  ;;  %1262 = vmatmul.msk.bf16.vlgmr.msra.gmra.mxu3 %vm604_vm0, %v1278_v19 }
  0x50   : > { %1252 = vmatmul.msk.bf16.vlgmr.msra.gmra.mxu0 %vm604_vm0, %v1268_v20  ;;  %1255 = vmatmul.msk.bf16.vlgmr.msra.gmra.mxu1 %vm604_vm0, %v1271_v21 }
  0x5f   : > { %1259 = vmatmul.msk.bf16.gmra.mxu2 %vm604_vm0, %v1275_v22  ;;  %1263 = vmatmul.msk.bf16.gmra.mxu3 %vm604_vm0, %v1279_v23 }
  0x60   : > { %1253 = vmatmul.msk.bf16.gmra.mxu0 %vm604_vm0, %v1269_v24  ;;  %1256 = vmatmul.msk.bf16.gmra.mxu1 %vm604_vm0, %v1272_v25  ;;  %v1404_v24 = vld [vmem:[%s1749_s21 + $0x8] sm:$0xff]   ;;  %v1407_v25 = vld [vmem:[%s1749_s21 + $0x20] sm:$0xff]  }
  0x6f   : > { %1260 = vmatmul.msk.bf16.gmra.mxu2 %vm604_vm0, %v1276_v26  ;;  %1264 = vmatmul.msk.bf16.gmra.mxu3 %vm604_vm0, %v1280_v27 }
  0x70   : > { %1254 = vmatmul.msk.bf16.gmra.mxu0 %vm604_vm0, %v1270_v28  ;;  %1257 = vmatmul.msk.bf16.gmra.mxu1 %vm604_vm0, %v1273_v29 }
  0x7f   : > { %1261 = vmatmul.msk.bf16.gmra.mxu2 %vm604_vm0, %v1277_v30 }
  0xcd   : > { %v653_v32 = vpop.f32.mrf.mxu0  ;;  %v668_v33 = vpop.f32.mrf.mxu1 }
  0xce   : > { %v802_v34 = vmul.f32 %v1821_v31, %v653_v32  ;;  %v808_v35 = vmul.f32 %v1821_v31, %v668_v33  ;;  %v1293_v32 = vunpack.c.l.bf16 %v1404_v24 }
  0xd0   : > { %v829_v40 = vadd.f32 %v1828_v38, %v802_v34  ;;  %v835_v42 = vadd.f32 %v1828_v38, %v808_v35  ;;  %v1305_v34 = vunpack.c.l.bf16 %v1407_v25 }
  0xd2   : > { %v683_v39 = vpop.f32.mrf.mxu2  ;;  %v703_v44 = vpop.f32.mrf.mxu3  ;;  %v907_v53 = vadd.f32 %v1289_v41, %v829_v40  ;;  %v913_v54 = vadd.f32 %v1301_v43, %v835_v42  ;;  %v1414_v40 = vld [vmem:[%s1749_s21 + $0x58] sm:$0xff]   ;;  %v1294_v43 = vunpack.c.h.bf16 %v1404_v24 }
  0xd3   : > { %v822_v45 = vmul.f32 %v1821_v31, %v703_v44  ;;  %v814_v47 = vmul.f32 %v1821_v31, %v683_v39  ;;  %v1333_v52 = vunpack.c.l.bf16 %v1414_v40 }
  0xd4   : > { %v933_v0 = vmax.f32 %v907_v53, 0.0  ;;  %v939_v1 = vmax.f32 %v913_v54, 0.0 }
  0xd5   : > { %v655_v48 = vpop.f32.mrf.mxu0  ;;  %v670_v50 = vpop.f32.mrf.mxu1  ;;  %v849_v57 = vadd.f32 %v1828_v38, %v822_v45  ;;  %v841_v61 = vadd.f32 %v1828_v38, %v814_v47  ;;  %v1306_v45 = vunpack.c.h.bf16 %v1407_v25 }
  0xd6   : > { %v803_v55 = vmul.f32 %v1821_v31, %v655_v48  ;;  %v809_v56 = vmul.f32 %v1821_v31, %v670_v50 }
  0xd7   : > { %v927_v7 = vadd.f32 %v1329_v58, %v849_v57  ;;  %v919_v12 = vadd.f32 %v1313_v62, %v841_v61  ;;  %v1318_v57 = vunpack.c.h.bf16 %v1410_v46 }
  0xd8   : > { %v830_v59 = vadd.f32 %v1828_v38, %v803_v55  ;;  %v836_v60 = vadd.f32 %v1828_v38, %v809_v56  ;;  %v1317_v56 = vunpack.c.l.bf16 %v1410_v46 }
  0xd9   : > { %v953_v22 = vmax.f32 %v927_v7, 0.0  ;;  %v945_v26 = vmax.f32 %v919_v12, 0.0 }
  0xda   : > { %v685_v2 = vpop.f32.mrf.mxu2  ;;  %v908_v3 = vadd.f32 %v1290_v49, %v830_v59  ;;  %v914_v4 = vadd.f32 %v1302_v51, %v836_v60  ;;  %v705_v5 = vpop.f32.mrf.mxu3 }
  0xdb   : > { %v815_v6 = vmul.f32 %v1821_v31, %v685_v2  ;;  %v823_v8 = vmul.f32 %v1821_v31, %v705_v5 }
  0xdc   : > { %v934_v10 = vmax.f32 %v908_v3, 0.0  ;;  %v940_v11 = vmax.f32 %v914_v4, 0.0  ;;  %v1334_v3 = vunpack.c.h.bf16 %v1414_v40  ;;  %v1411_v40 = vld [vmem:[%s1749_s21 + $0x40] sm:$0xff]  }
  0xdd   : > { %v842_v13 = vadd.f32 %v1828_v38, %v815_v6  ;;  %v850_v14 = vadd.f32 %v1828_v38, %v823_v8  ;;  %v658_v15 = vpop.f32.mrf.mxu0  ;;  %v673_v16 = vpop.f32.mrf.mxu1 }
  0xde   : > { %v1342_v17 = vpack.c.bf16 %v934_v10, %v933_v0  ;;  %v1357_v18 = vpack.c.bf16 %v940_v11, %v939_v1  ;;  %v804_v19 = vmul.f32 %v1821_v31, %v658_v15  ;;  %v810_v20 = vmul.f32 %v1821_v31, %v673_v16 }
  0xdf   : > { %v920_v21 = vadd.f32 %v1314_v63, %v842_v13  ;;  %v928_v23 = vadd.f32 %v1330_v9, %v850_v14 }
  0xe0   : > { %1343 = vst [vmem:[%s1852_s6] sm:$0xff] %v1342_v17   ;;  %v831_v30 = vadd.f32 %v1828_v38, %v804_v19  ;;  %v837_v33 = vadd.f32 %v1828_v38, %v810_v20  ;;  %v1408_v19 = vld [vmem:[%s1749_s21 + $0x28] sm:$0xff]  }
  0xe1   : > { %v946_v27 = vmax.f32 %v920_v21, 0.0  ;;  %1418 = vst [vmem:[%s1852_s6 + $0x18] sm:$0xff] %v1357_v18   ;;  %v954_v28 = vmax.f32 %v928_v23, 0.0  ;;  %v1405_v18 = vld [vmem:[%s1749_s21 + $0x10] sm:$0xff]  }
  0xe2   : > { %v688_v29 = vpop.f32.mrf.mxu2  ;;  %v708_v35 = vpop.f32.mrf.mxu3  ;;  %v909_v47 = vadd.f32 %v1293_v32, %v831_v30  ;;  %v915_v48 = vadd.f32 %v1305_v34, %v837_v33  ;;  %v1297_v25 = vunpack.c.l.bf16 %v1405_v18  ;;  %v1415_v33 = vld [vmem:[%s1749_s21 + $0x60] sm:$0xff]  }
  0xe3   : > { %v1372_v36 = vpack.c.bf16 %v946_v27, %v945_v26  ;;  %v1392_v37 = vpack.c.bf16 %v954_v28, %v953_v22  ;;  %v824_v39 = vmul.f32 %v1821_v31, %v708_v35  ;;  %v816_v41 = vmul.f32 %v1821_v31, %v688_v29 }
  0xe4   : > { %v935_v58 = vmax.f32 %v909_v47, 0.0  ;;  %v941_v59 = vmax.f32 %v915_v48, 0.0  ;;  %v1309_v27 = vunpack.c.l.bf16 %v1408_v19  ;;  %v1337_v46 = vunpack.c.l.bf16 %v1415_v33 }
  0xe5   : > { %1421 = vst [vmem:[%s1852_s6 + $0x30] sm:$0xff] %v1372_v36   ;;  %v660_v42 = vpop.f32.mrf.mxu0  ;;  %v675_v44 = vpop.f32.mrf.mxu1  ;;  %v851_v51 = vadd.f32 %v1828_v38, %v824_v39  ;;  %v843_v55 = vadd.f32 %v1828_v38, %v816_v41  ;;  %v1298_v36 = vunpack.c.h.bf16 %v1405_v18  ;;  %v1310_v39 = vunpack.c.h.bf16 %v1408_v19 }
  0xe6   : > { %1425 = vst [vmem:[%s1852_s6 + $0x50] sm:$0xff] %v1392_v37   ;;  %v805_v49 = vmul.f32 %v1821_v31, %v660_v42  ;;  %v811_v50 = vmul.f32 %v1821_v31, %v675_v44 }
  0xe7   : > { %v929_v1 = vadd.f32 %v1333_v52, %v851_v51  ;;  %v921_v6 = vadd.f32 %v1317_v56, %v843_v55  ;;  %v1322_v51 = vunpack.c.h.bf16 %v1411_v40 }
  0xe8   : > { %v832_v53 = vadd.f32 %v1828_v38, %v805_v49  ;;  %v838_v54 = vadd.f32 %v1828_v38, %v811_v50  ;;  %v1321_v50 = vunpack.c.l.bf16 %v1411_v40 }
  0xe9   : > { %v955_v16 = vmax.f32 %v929_v1, 0.0  ;;  %v947_v20 = vmax.f32 %v921_v6, 0.0 }
  0xea   : > { %v690_v60 = vpop.f32.mrf.mxu2  ;;  %v910_v61 = vadd.f32 %v1294_v43, %v832_v53  ;;  %v916_v62 = vadd.f32 %v1306_v45, %v838_v54  ;;  %v710_v63 = vpop.f32.mrf.mxu3 }
  0xeb   : > { %v817_v0 = vmul.f32 %v1821_v31, %v690_v60  ;;  %v825_v2 = vmul.f32 %v1821_v31, %v710_v63 }
  0xec   : > { %v936_v4 = vmax.f32 %v910_v61, 0.0  ;;  %v942_v5 = vmax.f32 %v916_v62, 0.0  ;;  %v1338_v61 = vunpack.c.h.bf16 %v1415_v33 }
  0xed   : > { %v844_v7 = vadd.f32 %v1828_v38, %v817_v0  ;;  %v852_v8 = vadd.f32 %v1828_v38, %v825_v2  ;;  %v663_v9 = vpop.f32.mrf.mxu0  ;;  %v678_v10 = vpop.f32.mrf.mxu1 }
  0xee   : > { %v1347_v11 = vpack.c.bf16 %v936_v4, %v935_v58  ;;  %v1362_v12 = vpack.c.bf16 %v942_v5, %v941_v59  ;;  %v806_v13 = vmul.f32 %v1821_v31, %v663_v9  ;;  %v812_v14 = vmul.f32 %v1821_v31, %v678_v10 }
  0xef   : > { %v922_v15 = vadd.f32 %v1318_v57, %v844_v7  ;;  %v930_v17 = vadd.f32 %v1334_v3, %v852_v8 }
  0xf0   : > { %1416 = vst [vmem:[%s1852_s6 + $0x8] sm:$0xff] %v1347_v11   ;;  %v833_v24 = vadd.f32 %v1828_v38, %v806_v13  ;;  %v839_v26 = vadd.f32 %v1828_v38, %v812_v14 }
  0xf1   : > { %v948_v21 = vmax.f32 %v922_v15, 0.0  ;;  %1419 = vst [vmem:[%s1852_s6 + $0x20] sm:$0xff] %v1362_v12   ;;  %v956_v22 = vmax.f32 %v930_v17, 0.0  ;;  %v1412_v15 = vld [vmem:[%s1749_s21 + $0x48] sm:$0xff]   ;;  %s1026_s21 = sshll.u32 %s1852_s6, 4  ;;  %s1027_s21 = int_to_ptr.vmem [resolvable:$true] %s1026_s21 }
  0xf2   : > { %v693_v23 = vpop.f32.mrf.mxu2  ;;  %v713_v28 = vpop.f32.mrf.mxu3  ;;  %v911_v41 = vadd.f32 %v1297_v25, %v833_v24  ;;  %v917_v42 = vadd.f32 %v1309_v27, %v839_v26  ;;  %v1325_v17 = vunpack.c.l.bf16 %v1412_v15 }
  0xf3   : > { %v1377_v29 = vpack.c.bf16 %v948_v21, %v947_v20  ;;  %v1397_v30 = vpack.c.bf16 %v956_v22, %v955_v16  ;;  %v826_v32 = vmul.f32 %v1821_v31, %v713_v28  ;;  %v818_v34 = vmul.f32 %v1821_v31, %v693_v23 }
  0xf4   : > { %v937_v52 = vmax.f32 %v911_v41, 0.0  ;;  %v943_v53 = vmax.f32 %v917_v42, 0.0  ;;  %v1326_v20 = vunpack.c.h.bf16 %v1412_v15 }
  0xf5   : > { %1422 = vst [vmem:[%s1852_s6 + $0x38] sm:$0xff] %v1377_v29   ;;  %v665_v35 = vpop.f32.mrf.mxu0  ;;  %v680_v37 = vpop.f32.mrf.mxu1  ;;  %v853_v45 = vadd.f32 %v1828_v38, %v826_v32  ;;  %v845_v49 = vadd.f32 %v1828_v38, %v818_v34 }
  0xf6   : > { %1426 = vst [vmem:[%s1852_s6 + $0x58] sm:$0xff] %v1397_v30   ;;  %v807_v43 = vmul.f32 %v1821_v31, %v665_v35  ;;  %v813_v44 = vmul.f32 %v1821_v31, %v680_v37 }
  0xf7   : > { %v931_v59 = vadd.f32 %v1337_v46, %v853_v45  ;;  %v923_v0 = vadd.f32 %v1321_v50, %v845_v49 }
  0xf8   : > { %v834_v47 = vadd.f32 %v1828_v38, %v807_v43  ;;  %v840_v48 = vadd.f32 %v1828_v38, %v813_v44 }
  0xf9   : > { %v957_v6 = vmax.f32 %v931_v59, 0.0  ;;  %v949_v8 = vmax.f32 %v923_v0, 0.0 }
  0xfa   : > { %v695_v54 = vpop.f32.mrf.mxu2  ;;  %v912_v55 = vadd.f32 %v1298_v36, %v834_v47  ;;  %v918_v56 = vadd.f32 %v1310_v39, %v840_v48  ;;  %v715_v57 = vpop.f32.mrf.mxu3 }
  0xfb   : > { %v819_v58 = vmul.f32 %v1821_v31, %v695_v54  ;;  %v827_v60 = vmul.f32 %v1821_v31, %v715_v57 }
  0xfc   : > { %v938_v62 = vmax.f32 %v912_v55, 0.0  ;;  %v944_v63 = vmax.f32 %v918_v56, 0.0 }
  0xfd   : > { %v846_v1 = vadd.f32 %v1828_v38, %v819_v58  ;;  %v854_v2 = vadd.f32 %v1828_v38, %v827_v60 }
  0xfe   : > { %v1352_v3 = vpack.c.bf16 %v938_v62, %v937_v52  ;;  %v1367_v4 = vpack.c.bf16 %v944_v63, %v943_v53 }
  0xff   : > { %v924_v5 = vadd.f32 %v1322_v51, %v846_v1  ;;  %v932_v7 = vadd.f32 %v1338_v61, %v854_v2 }
 0x100   : > { %1417 = vst [vmem:[%s1852_s6 + $0x10] sm:$0xff] %v1352_v3  }
 0x101   : > { %v950_v9 = vmax.f32 %v924_v5, 0.0  ;;  %1420 = vst [vmem:[%s1852_s6 + $0x28] sm:$0xff] %v1367_v4   ;;  %v958_v10 = vmax.f32 %v932_v7, 0.0 }
 0x102   : > { %v698_v11 = vpop.f32.mrf.mxu2 }
 0x103   : > { %v1382_v12 = vpack.c.bf16 %v950_v9, %v949_v8  ;;  %v1402_v13 = vpack.c.bf16 %v958_v10, %v957_v6  ;;  %v820_v14 = vmul.f32 %v1821_v31, %v698_v11 }
 0x105   : > { %1423 = vst [vmem:[%s1852_s6 + $0x40] sm:$0xff] %v1382_v12   ;;  %v847_v16 = vadd.f32 %v1828_v38, %v820_v14 }
 0x106   : > { %1427 = vst [vmem:[%s1852_s6 + $0x60] sm:$0xff] %v1402_v13  }
 0x107   : > { %v925_v21 = vadd.f32 %v1325_v17, %v847_v16 }
 0x109   : > { %v951_v24 = vmax.f32 %v925_v21, 0.0 }
 0x10a   : > { %v700_v18 = vpop.f32.mrf.mxu2 }
 0x10b   : > { %v821_v19 = vmul.f32 %v1821_v31, %v700_v18 }
 0x10d   : > { %v848_v22 = vadd.f32 %v1828_v38, %v821_v19 }
 0x10f   : > { %v926_v23 = vadd.f32 %v1326_v20, %v848_v22 }
 0x111   : > { %v952_v25 = vmax.f32 %v926_v23, 0.0 }
 0x113   : > { %v1387_v26 = vpack.c.bf16 %v952_v25, %v951_v24 }
 0x115   : > { %1424 = vst [vmem:[%s1852_s6 + $0x48] sm:$0xff] %v1387_v26  }
 0x116   : > { %1570 = shalt.err (!%p1567_p10)
}
 0x117   : > { %s1630_s11 = smov 64   ;;  %s1631_s7 = smov 128  }
 0x118   : > { %s1632_s6 = smov 4  }
 0x119   : > { %1452 = dma.vmem_to_hbm [thread:$0]  (%p1709_p9), %s1027_s21, 1664, %s1029_s12, %s1012_s18, %s1630_s11, %s1631_s7, %s1632_s6  }
 0x11a PF: > { %s1043_s13 = sand.u32 1, %s1605_s15   ;;  %p1455_p13 = pnand %p1171_p12, %p1716_p11 }
 0x11b   : > { %s1044_s8 = scalar_lea.sflag [#allocation6], %s1043_s13 }
 0x11c   : > { %p1456_p0 = pneg %p1455_p13 }
 0x11e   : > { %1600 = dma.done.wait (%p1456_p0), %s1044_s8, 1664  }
 0x11f   : > { %1602 = vsyncadd (%p1456_p0), %s1044_s8, 4294965632  ;;  %s20_s20 = sadd.s32 1, %s1625_s20   ;;  %s1956_s15 = smov %s1609_s16 }
 0x120   : > { %p17_p1 = scmp.ge.s32.totalorder %s20_s20, 4   ;;  %s1957_s16 = smov %s1613_s17 }
 0x121   : > { %s1958_s17 = smov %s1714_s29  ;;  %s1959_s18 = smov %s1621_s19 }
 0x122   : > { %s1960_s19 = smov %s1962_s23  ;;  %19 = sbr.rel (!%p17_p1) target bundleno = 6 (0x6), region = 144 }
 0x127   :  { %1050 = vsyncpa [#allocation5], 1 }
 0x128   :  { %1052 = vsyncpa [#allocation5 + $0x1], 1 }
 0x129   :  { %1053 = vsyncpa [#allocation6], 1 }
 0x12a   :  { %1055 = vsyncpa [#allocation6 + $0x1], 1 }

</bundles_post_ra>
